<compile_context>
chip_gen: v6e
topology: v6e:2x2x1
jax: 0.10.0
libtpu: 0.0.40
codegen_flags: <defaults>
</compile_context>

<pallas_src>
import functools

import jax
import jax.numpy as jnp
from jax.experimental import pallas as pl
from jax.experimental.pallas import tpu as pltpu

EPS = 1e-5


def _round_up(x, m):
    return (x + m - 1) // m * m


def _pick_tile(padded_dim, candidates):
    for t in candidates:
        if padded_dim % t == 0:
            return t
    return 128


def _conv_stats_kernel(p_ref, w_ref, y_ref, stats_ref, acc_ref, *, tk, tn):
    # p_ref:     (TM, TK)    bf16 im2col patch tile
    # w_ref:     (Kp, Coutp) bf16 full weight matrix, VMEM-resident (fetched once)
    # y_ref:     (TM, TN)    bf16 raw conv output tile
    # stats_ref: (1, 2, TN)  f32 per-(M-tile, channel) partial [sum, sumsq]
    # acc_ref:   (TM, TN)    f32 accumulator (persists across K grid axis)
    j = pl.program_id(1)
    k = pl.program_id(2)

    @pl.when(k == 0)
    def _():
        acc_ref[...] = jnp.zeros_like(acc_ref)

    wk = w_ref[pl.ds(pl.multiple_of(k * tk, tk), tk),
               pl.ds(pl.multiple_of(j * tn, tn), tn)]
    acc_ref[...] += jnp.dot(p_ref[...], wk, preferred_element_type=jnp.float32)

    @pl.when(k == pl.num_programs(2) - 1)
    def _():
        y = acc_ref[...]                      # f32
        y_ref[...] = y.astype(y_ref.dtype)    # store intermediate as bf16
        # Single-sweep sum / sum-of-squares in f32 from the f32 accumulator
        # (E[y^2] - E[y]^2 form; documented cancellation caveat for huge M).
        stats_ref[0, 0:1, :] = jnp.sum(y, axis=0, keepdims=True)
        stats_ref[0, 1:2, :] = jnp.sum(y * y, axis=0, keepdims=True)


def _bn_relu_kernel(y_ref, scale_ref, shift_ref, o_ref):
    # Fused BN apply (y * scale + shift) + ReLU on lane-dense tiles.
    y = y_ref[...].astype(jnp.float32)
    o_ref[...] = jnp.maximum(y * scale_ref[...] + shift_ref[...], 0.0)


def _im2col_nhwc(x_nhwc, kh, kw, stride, pad):
    """x_nhwc: (N, H, W, Cin) -> (N*OH*OW, KH*KW*Cin); K ordered (kh, kw, cin).

    Channels-last build: each (kh, kw) window is a plain strided slice and the
    K axis is assembled with a cheap last-axis concat (no 5-D minor transpose).
    """
    n, h, w, cin = x_nhwc.shape
    oh = (h + 2 * pad - kh) // stride + 1
    ow = (w + 2 * pad - kw) // stride + 1
    xp = jnp.pad(x_nhwc, ((0, 0), (pad, pad), (pad, pad), (0, 0)))
    cols = []
    for i in range(kh):
        for j in range(kw):
            cols.append(xp[:, i:i + stride * oh:stride, j:j + stride * ow:stride, :])
    patches = jnp.concatenate(cols, axis=-1) if len(cols) > 1 else cols[0]
    return patches.reshape(n * oh * ow, kh * kw * cin), oh, ow


@functools.partial(jax.jit, static_argnames=("stride", "padding"))
def basic_conv2d(x, weight, gamma, beta, *, stride=1, padding=1):
    """x: (N, Cin, H, W); weight: (Cout, Cin, KH, KW); gamma/beta: (Cout,).
    Returns (N, Cout, OH, OW) float32."""
    n = x.shape[0]
    cout, cin, kh, kw = weight.shape

    # bf16 MXU operands (accumulation stays f32 inside the kernel).
    x_nhwc = jnp.transpose(x, (0, 2, 3, 1)).astype(jnp.bfloat16)
    patches, oh, ow = _im2col_nhwc(x_nhwc, kh, kw, stride, padding)
    m, kdim = patches.shape

    # Lane-dense padding: K, Cout to multiples of 128; M up to the M tile.
    kp = _round_up(kdim, 128)
    coutp = _round_up(cout, 128)
    tm = 512 if m > 512 else 256            # small-M: keep >=2 parallel tiles (v7x)
    mp = _round_up(m, tm)
    tk = _pick_tile(kp, (512, 256, 128))
    tn = _pick_tile(coutp, (512, 384, 256, 128))  # large tn: fewer patch re-reads

    patches = jnp.pad(patches, ((0, mp - m), (0, kp - kdim)))
    # K ordered (kh, kw, cin) -> weight (KH, KW, Cin, Cout) flattened to (K, Cout).
    w_mat = weight.astype(jnp.bfloat16).transpose(2, 3, 1, 0).reshape(kdim, cout)
    w_mat = jnp.pad(w_mat, ((0, kp - kdim), (0, coutp - cout)))

    m_tiles, n_tiles, k_tiles = mp // tm, coutp // tn, kp // tk

    # VMEM budget (double-buffered patches / resident weight / y + f32 acc);
    # only raise the scoped limit when exceeding the smallest (v5e) default.
    vmem_est = (2 * tm * tk * 2 + 2 * kp * coutp * 2 + 2 * tm * tn * 2
                + 2 * 2 * tn * 4 + tm * tn * 4)
    vmem_limit = None
    if vmem_est > 14 * 1024 * 1024:
        vmem_limit = min(int(vmem_est * 1.5) + (2 << 20), 96 * 1024 * 1024)

    # ---- Pass 1: tiled conv matmul + per-channel partial statistics ----------
    y, stats = pl.pallas_call(
        functools.partial(_conv_stats_kernel, tk=tk, tn=tn),
        out_shape=(
            jax.ShapeDtypeStruct((mp, coutp), jnp.bfloat16),
            jax.ShapeDtypeStruct((m_tiles, 2, coutp), jnp.float32),
        ),
        grid_spec=pltpu.PrefetchScalarGridSpec(
            num_scalar_prefetch=0,
            grid=(m_tiles, n_tiles, k_tiles),
            in_specs=[
                pl.BlockSpec((tm, tk), lambda i, j, k: (i, k)),
                # Full weight matrix, constant block index -> DMA'd once, kept
                # resident in VMEM; sliced in-kernel per (j, k).
                pl.BlockSpec((kp, coutp), lambda i, j, k: (0, 0)),
            ],
            out_specs=[
                pl.BlockSpec((tm, tn), lambda i, j, k: (i, j)),
                pl.BlockSpec((1, 2, tn), lambda i, j, k: (i, 0, j)),
            ],
            scratch_shapes=[pltpu.VMEM((tm, tn), jnp.float32)],
        ),
        compiler_params=pltpu.CompilerParams(
            dimension_semantics=("parallel", "parallel", "arbitrary"),
            vmem_limit_bytes=vmem_limit),
    )(patches, w_mat)

    # ---- Tiny per-channel glue: BN (training-mode, biased var, eps=1e-5) -----
    # Padded M rows / Cout cols are exactly zero, so sums are unaffected;
    # divide by the true sample count m.
    tot = jnp.sum(stats, axis=0)                 # (2, Coutp)
    inv_m = 1.0 / float(m)
    mean = tot[0] * inv_m
    var = jnp.maximum(tot[1] * inv_m - mean * mean, 0.0)

    gamma_p = jnp.pad(gamma.astype(jnp.float32), (0, coutp - cout))
    beta_p = jnp.pad(beta.astype(jnp.float32), (0, coutp - cout))
    scale_vec = gamma_p * jax.lax.rsqrt(var + EPS)
    shift_vec = beta_p - mean * scale_vec
    scale = scale_vec.reshape(1, coutp)
    shift = shift_vec.reshape(1, coutp)

    # ---- Pass 2: tiled fused scale/shift + ReLU (bf16 in, f32 out) -----------
    out_flat = pl.pallas_call(
        _bn_relu_kernel,
        out_shape=jax.ShapeDtypeStruct((mp, coutp), jnp.float32),
        grid_spec=pltpu.PrefetchScalarGridSpec(
            num_scalar_prefetch=0,
            grid=(m_tiles, n_tiles),
            in_specs=[
                pl.BlockSpec((tm, tn), lambda i, j: (i, j)),
                pl.BlockSpec((1, tn), lambda i, j: (0, j)),
                pl.BlockSpec((1, tn), lambda i, j: (0, j)),
            ],
            out_specs=pl.BlockSpec((tm, tn), lambda i, j: (i, j)),
        ),
        compiler_params=pltpu.CompilerParams(
            dimension_semantics=("parallel", "parallel")),
    )(y, scale, shift)

    # (Mp, Coutp) -> strip padding -> (N, OH, OW, Cout) -> NCHW (matches PyTorch).
    out = out_flat[:m, :cout].reshape(n, oh, ow, cout).transpose(0, 3, 1, 2)
    return out


def _reference(x, weight, gamma, beta, stride, padding):
    y = jax.lax.conv_general_dilated(
        x, weight, window_strides=(stride, stride),
        padding=((padding, padding), (padding, padding)),
        dimension_numbers=("NCHW", "OIHW", "NCHW"))
    mean = y.mean(axis=(0, 2, 3), keepdims=True)
    var = y.var(axis=(0, 2, 3), keepdims=True)
    yn = (y - mean) * jax.lax.rsqrt(var + EPS)
    return jnp.maximum(yn * gamma.reshape(1, -1, 1, 1) + beta.reshape(1, -1, 1, 1), 0.0)


if __name__ == "__main__":
    key = jax.random.PRNGKey(0)
    k_x, k_w, k_g, k_b = jax.random.split(key, 4)

    N, Cin, H, W = 2, 4, 16, 16
    Cout, KH, KW = 8, 3, 3

    x = jax.random.normal(k_x, (N, Cin, H, W), dtype=jnp.float32)
    weight = 0.1 * jax.random.normal(k_w, (Cout, Cin, KH, KW), dtype=jnp.float32)
    gamma = 1.0 + 0.1 * jax.random.normal(k_g, (Cout,), dtype=jnp.float32)
    beta = 0.1 * jax.random.normal(k_b, (Cout,), dtype=jnp.float32)

    out = basic_conv2d(x, weight, gamma, beta, stride=1, padding=1)
    jax.block_until_ready(out)

    assert out.shape == (N, Cout, H, W), out.shape
    assert bool(jnp.all(out >= 0.0)), "ReLU output must be non-negative"

    ref = _reference(x, weight, gamma, beta, 1, 1)
    max_err = float(jnp.max(jnp.abs(out - ref)))
    # bf16 MXU operands + bf16 intermediate => loose tolerance vs f32 reference.
    assert max_err < 0.15, f"max abs error vs reference too large: {max_err}"
    print("KERNEL_OK")
</pallas_src>

<mosaic_0001>
module attributes {stable_mosaic.version = 11 : i64} {
  func.func @_conv_stats_kernel(%arg0: i32, %arg1: i32, %arg2: i32, %arg3: memref<256x128xbf16, #tpu.memory_space<vmem>>, %arg4: memref<128x128xbf16, #tpu.memory_space<vmem>>, %arg5: memref<256x128xbf16, #tpu.memory_space<vmem>>, %arg6: memref<1x2x128xf32, #tpu.memory_space<vmem>>, %arg7: memref<256x128xf32, #tpu.memory_space<vmem>>) attributes {dimension_semantics = [#tpu.dimension_semantics<parallel>, #tpu.dimension_semantics<parallel>, #tpu.dimension_semantics<arbitrary>], iteration_bounds = array<i64: 2, 1, 1>, scalar_prefetch = 0 : i64, scratch_operands = 1 : i64, tpu.core_type = #tpu.core_type<tc>, window_params = [{transform_indices = @transform_0, window_bounds = array<i64: 256, 128>}, {pipeline_mode = #tpu.pipeline_mode<synchronous>, transform_indices = @transform_1, window_bounds = array<i64: 128, 128>}, {transform_indices = @transform_2, window_bounds = array<i64: 256, 128>}, {transform_indices = @transform_3, window_bounds = array<i64: 1, 2, 128>}]} {
    %c0_i32 = arith.constant 0 : i32
    %0 = arith.cmpi eq, %arg2, %c0_i32 : i32
    %1 = arith.extui %0 : i1 to i32
    %c0_i32_0 = arith.constant 0 : i32
    %2 = arith.cmpi ne, %1, %c0_i32_0 : i32
    scf.if %2 {
      %cst_9 = arith.constant 0.000000e+00 : f32
      %18 = vector.broadcast %cst_9 : f32 to vector<256x128xf32>
      %c0_10 = arith.constant 0 : index
      %c0_11 = arith.constant 0 : index
      %19 = vector.load %arg7[%c0_10, %c0_11] : memref<256x128xf32, #tpu.memory_space<vmem>>, vector<256x128xf32>
      tpu.vector_store %arg7[%c0_10, %c0_11], %18 {strides = array<i32>} : memref<256x128xf32, #tpu.memory_space<vmem>>, vector<256x128xf32>,
    } else {
    }
    %c128_i32 = arith.constant 128 : i32
    %3 = arith.muli %arg2, %c128_i32 : i32
    %4 = tpu.assume_multiple %3, 128 : i32
    %c128_i32_1 = arith.constant 128 : i32
    %5 = arith.muli %arg1, %c128_i32_1 : i32
    %6 = tpu.assume_multiple %5, 128 : i32
    %7 = arith.index_cast %4 : i32 to index
    %8 = arith.index_cast %6 : i32 to index
    %9 = vector.load %arg4[%7, %8] : memref<128x128xbf16, #tpu.memory_space<vmem>>, vector<128x128xbf16>
    %c0 = arith.constant 0 : index
    %c0_2 = arith.constant 0 : index
    %10 = vector.load %arg7[%c0, %c0_2] : memref<256x128xf32, #tpu.memory_space<vmem>>, vector<256x128xf32>
    %c0_3 = arith.constant 0 : index
    %c0_4 = arith.constant 0 : index
    %11 = vector.load %arg3[%c0_3, %c0_4] : memref<256x128xbf16, #tpu.memory_space<vmem>>, vector<256x128xbf16>
    %cst = arith.constant dense<0.000000e+00> : vector<256x128xf32>
    %12 = tpu.matmul %11, %9, %cst {dimension_numbers = #tpu.dot_dimension_numbers<[1], [0], [0], [1], [0, 0, 1, 1], [], []>} : vector<256x128xbf16>, vector<128x128xbf16>, vector<256x128xf32> -> vector<256x128xf32>
    %13 = arith.addf %10, %12 : vector<256x128xf32>
    %c0_5 = arith.constant 0 : index
    %c0_6 = arith.constant 0 : index
    %14 = vector.load %arg7[%c0_5, %c0_6] : memref<256x128xf32, #tpu.memory_space<vmem>>, vector<256x128xf32>
    tpu.vector_store %arg7[%c0_5, %c0_6], %13 {strides = array<i32>} : memref<256x128xf32, #tpu.memory_space<vmem>>, vector<256x128xf32>,
    %c0_i32_7 = arith.constant 0 : i32
    %15 = arith.cmpi eq, %arg2, %c0_i32_7 : i32
    %16 = arith.extui %15 : i1 to i32
    %c0_i32_8 = arith.constant 0 : i32
    %17 = arith.cmpi ne, %16, %c0_i32_8 : i32
    scf.if %17 {
      %c0_9 = arith.constant 0 : index
      %c0_10 = arith.constant 0 : index
      %18 = vector.load %arg7[%c0_9, %c0_10] : memref<256x128xf32, #tpu.memory_space<vmem>>, vector<256x128xf32>
      %19 = arith.truncf %18 : vector<256x128xf32> to vector<256x128xbf16>
      %c0_11 = arith.constant 0 : index
      %c0_12 = arith.constant 0 : index
      %20 = vector.load %arg5[%c0_11, %c0_12] : memref<256x128xbf16, #tpu.memory_space<vmem>>, vector<256x128xbf16>
      tpu.vector_store %arg5[%c0_11, %c0_12], %19 {strides = array<i32>} : memref<256x128xbf16, #tpu.memory_space<vmem>>, vector<256x128xbf16>,
      %cst_13 = arith.constant dense<0.000000e+00> : vector<128xf32>
      %21 = vector.multi_reduction <add>, %18, %cst_13 [0] : vector<256x128xf32> to vector<128xf32>
      %22 = vector.shape_cast %21 : vector<128xf32> to vector<1x128xf32>
      %c0_14 = arith.constant 0 : index
      %c0_15 = arith.constant 0 : index
      %c0_16 = arith.constant 0 : index
      %23 = vector.load %arg6[%c0_14, %c0_15, %c0_16] : memref<1x2x128xf32, #tpu.memory_space<vmem>>, vector<1x1x128xf32>
      %24 = vector.shape_cast %23 : vector<1x1x128xf32> to vector<1x128xf32>
      %25 = vector.shape_cast %22 : vector<1x128xf32> to vector<1x1x128xf32>
      tpu.vector_store %arg6[%c0_14, %c0_15, %c0_16], %25 {strides = array<i32>} : memref<1x2x128xf32, #tpu.memory_space<vmem>>, vector<1x1x128xf32>,
      %26 = arith.mulf %18, %18 : vector<256x128xf32>
      %cst_17 = arith.constant dense<0.000000e+00> : vector<128xf32>
      %27 = vector.multi_reduction <add>, %26, %cst_17 [0] : vector<256x128xf32> to vector<128xf32>
      %28 = vector.shape_cast %27 : vector<128xf32> to vector<1x128xf32>
      %c0_18 = arith.constant 0 : index
      %c1 = arith.constant 1 : index
      %c0_19 = arith.constant 0 : index
      %29 = vector.load %arg6[%c0_18, %c1, %c0_19] : memref<1x2x128xf32, #tpu.memory_space<vmem>>, vector<1x1x128xf32>
      %30 = vector.shape_cast %29 : vector<1x1x128xf32> to vector<1x128xf32>
      %31 = vector.shape_cast %28 : vector<1x128xf32> to vector<1x1x128xf32>
      tpu.vector_store %arg6[%c0_18, %c1, %c0_19], %31 {strides = array<i32>} : memref<1x2x128xf32, #tpu.memory_space<vmem>>, vector<1x1x128xf32>,
    } else {
    }
    return
  }
  func.func @transform_0(%arg0: i32, %arg1: i32, %arg2: i32) -> (i32, i32) {
    %c0_i32 = arith.constant 0 : i32
    return %arg0, %arg2 : i32, i32
  }
  func.func @transform_1(%arg0: i32, %arg1: i32, %arg2: i32) -> (i32, i32) {
    %c0_i32 = arith.constant 0 : i32
    %c0_i32_0 = arith.constant 0 : i32
    %c0_i32_1 = arith.constant 0 : i32
    return %c0_i32, %c0_i32_0 : i32, i32
  }
  func.func @transform_2(%arg0: i32, %arg1: i32, %arg2: i32) -> (i32, i32) {
    %c0_i32 = arith.constant 0 : i32
    return %arg0, %arg1 : i32, i32
  }
  func.func @transform_3(%arg0: i32, %arg1: i32, %arg2: i32) -> (i32, i32, i32) {
    %c0_i32 = arith.constant 0 : i32
    %c0_i32_0 = arith.constant 0 : i32
    return %arg0, %c0_i32, %arg1 : i32, i32, i32
  }
}

module attributes {stable_mosaic.version = 11 : i64} {
  func.func @_bn_relu_kernel(%arg0: i32, %arg1: i32, %arg2: memref<256x128xbf16, #tpu.memory_space<vmem>>, %arg3: memref<1x128xf32, #tpu.memory_space<vmem>>, %arg4: memref<1x128xf32, #tpu.memory_space<vmem>>, %arg5: memref<256x128xf32, #tpu.memory_space<vmem>>) attributes {dimension_semantics = [#tpu.dimension_semantics<parallel>, #tpu.dimension_semantics<parallel>], iteration_bounds = array<i64: 2, 1>, scalar_prefetch = 0 : i64, scratch_operands = 0 : i64, tpu.core_type = #tpu.core_type<tc>, window_params = [{transform_indices = @transform_0, window_bounds = array<i64: 256, 128>}, {transform_indices = @transform_1, window_bounds = array<i64: 1, 128>}, {transform_indices = @transform_2, window_bounds = array<i64: 1, 128>}, {transform_indices = @transform_3, window_bounds = array<i64: 256, 128>}]} {
    %c0 = arith.constant 0 : index
    %c0_0 = arith.constant 0 : index
    %0 = vector.load %arg2[%c0, %c0_0] : memref<256x128xbf16, #tpu.memory_space<vmem>>, vector<256x128xbf16>
    %1 = arith.extf %0 : vector<256x128xbf16> to vector<256x128xf32>
    %c0_1 = arith.constant 0 : index
    %c0_2 = arith.constant 0 : index
    %2 = vector.load %arg3[%c0_1, %c0_2] : memref<1x128xf32, #tpu.memory_space<vmem>>, vector<1x128xf32>
    %3 = vector.broadcast %2 : vector<1x128xf32> to vector<256x128xf32>
    %4 = arith.mulf %1, %3 : vector<256x128xf32>
    %c0_3 = arith.constant 0 : index
    %c0_4 = arith.constant 0 : index
    %5 = vector.load %arg4[%c0_3, %c0_4] : memref<1x128xf32, #tpu.memory_space<vmem>>, vector<1x128xf32>
    %6 = vector.broadcast %5 : vector<1x128xf32> to vector<256x128xf32>
    %7 = arith.addf %4, %6 : vector<256x128xf32>
    %cst = arith.constant 0.000000e+00 : f32
    %8 = vector.broadcast %cst : f32 to vector<256x128xf32>
    %9 = arith.maximumf %7, %8 : vector<256x128xf32>
    %c0_5 = arith.constant 0 : index
    %c0_6 = arith.constant 0 : index
    %10 = vector.load %arg5[%c0_5, %c0_6] : memref<256x128xf32, #tpu.memory_space<vmem>>, vector<256x128xf32>
    tpu.vector_store %arg5[%c0_5, %c0_6], %9 {strides = array<i32>} : memref<256x128xf32, #tpu.memory_space<vmem>>, vector<256x128xf32>,
    return
  }
  func.func @transform_0(%arg0: i32, %arg1: i32) -> (i32, i32) {
    %c0_i32 = arith.constant 0 : i32
    return %arg0, %arg1 : i32, i32
  }
  func.func @transform_1(%arg0: i32, %arg1: i32) -> (i32, i32) {
    %c0_i32 = arith.constant 0 : i32
    %c0_i32_0 = arith.constant 0 : i32
    return %c0_i32, %arg1 : i32, i32
  }
  func.func @transform_2(%arg0: i32, %arg1: i32) -> (i32, i32) {
    %c0_i32 = arith.constant 0 : i32
    %c0_i32_0 = arith.constant 0 : i32
    return %c0_i32, %arg1 : i32, i32
  }
  func.func @transform_3(%arg0: i32, %arg1: i32) -> (i32, i32) {
    %c0_i32 = arith.constant 0 : i32
    return %arg0, %arg1 : i32, i32
  }
}

</mosaic_0001>

<bundles_post_ra>
// kernel: basic_conv2d.3
= control target key start
LH: loop header
LB: loop body
LE: loop exit
PB: predicated region body
PF: predicated region fallthrough
CT: control target
= control target key end

     0   :  { %s703_s12 = smov 0   ;;  %s705_s13 = smov 0   ;;  %s866_s0 = inlined_call_operand.vmem [shape: bf16[512,128], index: 0, kind: input, shape index: {}]   ;;  %s867_s1 = inlined_call_operand.vmem [shape: f32[1,128], index: 1, kind: input, shape index: {}]   ;;  %s868_s2 = inlined_call_operand.vmem [shape: f32[1,128], index: 2, kind: input, shape index: {}]   ;;  %s869_s3 = inlined_call_operand.vmem [shape: f32[512,128], index: 3, kind: output, shape index: {}]  }
   0x1   :  { %s707_s14 = smov 0  }
   0x2 LB: > { %s25_s15 = sadd.s32 1, %s677_s13  ;;  %p547_p0 = scmp.ge.s32.totalorder %s681_s14, 1  ;;  %s681_s14 = sphi %s707_s14, %s13_s14   ;;  %s677_s13 = sphi %s705_s13, %s871_s13   ;;  %s673_s12 = sphi %s703_s12, %s870_s12  }
   0x3   : > { %p27_p1 = scmp.ge.s32.totalorder %s25_s15, 2  ;;  %p173_p2 = scmp.lt.s32.totalorder %s681_s14, 3 }
   0x5   : > { %s873_s15 = smov (%p27_p1, %s25_s15), 0  ;;  %p174_p3 = pnand %p547_p0, %p173_p2 }
   0x6   : > { %s548_s16 = sshll.u32 (!%p174_p3), %s673_s12, 5 }
   0x7   : > { %177 = sbr.rel (%p174_p3) target bundleno = 52 (0x34), region = 32  ;;  %p210_p4 = scmp.lt.s32.totalorder (!%p174_p3), %s548_s16, 63 }
   0xc   : > { %s875_s16 = smov (!%p210_p4, %s548_s16), 63  ;;  %v732_v0 = vld [vmem:[%s867_s1] ss:$0 sm:$0xff] }
   0xd   : > { %s549_s17 = sshll.u32 %s875_s16, 2  ;;  %v741_v9 = vld [vmem:[%s868_s2] ss:$0 sm:$0xff]  ;;  %s551_s25 = sshll.u32 %s875_s16, 3 }
   0xe   : > { %s727_s20 = scalar_lea.vmem %s866_s0, %s549_s17  ;;  %s759_s28 = scalar_lea.vmem %s869_s3, %s551_s25 }
   0xf   : > { %v557_v1 = vld [vmem:[%s727_s20] sm:$0xff]   ;;  %v620_v2 = vld [vmem:[%s727_s20 + $0x8] sm:$0xff]   ;;  %v621_v3 = vld [vmem:[%s727_s20 + $0x10] sm:$0xff]  }
  0x10   : > { %v558_v4 = vunpack.c.l.bf16 %v557_v1  ;;  %v559_v5 = vunpack.c.h.bf16 %v557_v1  ;;  %v562_v6 = vunpack.c.l.bf16 %v620_v2  ;;  %v563_v7 = vunpack.c.h.bf16 %v620_v2  ;;  %v622_v8 = vld [vmem:[%s727_s20 + $0x18] sm:$0xff]   ;;  %v623_v30 = vld [vmem:[%s727_s20 + $0x20] sm:$0xff]   ;;  %v624_v31 = vld [vmem:[%s727_s20 + $0x28] sm:$0xff]  }
  0x11   : > { %v566_v10 = vunpack.c.l.bf16 %v621_v3  ;;  %v567_v11 = vunpack.c.h.bf16 %v621_v3  ;;  %v570_v12 = vunpack.c.l.bf16 %v622_v8  ;;  %v571_v13 = vunpack.c.h.bf16 %v622_v8  ;;  %v625_v36 = vld [vmem:[%s727_s20 + $0x30] sm:$0xff]   ;;  %v626_v37 = vld [vmem:[%s727_s20 + $0x38] sm:$0xff]   ;;  %v627_v3 = vld [vmem:[%s727_s20 + $0x40] sm:$0xff]  }
  0x12   : > { %v304_v14 = vmul.f32 %v558_v4, %v732_v0  ;;  %v305_v15 = vmul.f32 %v559_v5, %v732_v0  ;;  %v306_v16 = vmul.f32 %v562_v6, %v732_v0  ;;  %v307_v17 = vmul.f32 %v563_v7, %v732_v0  ;;  %v628_v4 = vld [vmem:[%s727_s20 + $0x48] sm:$0xff]  }
  0x13   : > { %v308_v18 = vmul.f32 %v566_v10, %v732_v0  ;;  %v309_v19 = vmul.f32 %v567_v11, %v732_v0  ;;  %v310_v20 = vmul.f32 %v570_v12, %v732_v0  ;;  %v311_v21 = vmul.f32 %v571_v13, %v732_v0  ;;  %v629_v10 = vld [vmem:[%s727_s20 + $0x50] sm:$0xff]   ;;  %v630_v11 = vld [vmem:[%s727_s20 + $0x58] sm:$0xff]  }
  0x14   : > { %v343_v22 = vadd.f32 %v741_v9, %v304_v14  ;;  %v344_v23 = vadd.f32 %v741_v9, %v305_v15  ;;  %v345_v24 = vadd.f32 %v741_v9, %v306_v16  ;;  %v346_v25 = vadd.f32 %v741_v9, %v307_v17 }
  0x15   : > { %v347_v26 = vadd.f32 %v741_v9, %v308_v18  ;;  %v348_v27 = vadd.f32 %v741_v9, %v309_v19  ;;  %v349_v28 = vadd.f32 %v741_v9, %v310_v20  ;;  %v350_v29 = vadd.f32 %v741_v9, %v311_v21 }
  0x16   : > { %v375_v32 = vmax.f32 %v343_v22, 0.0  ;;  %v376_v33 = vmax.f32 %v344_v23, 0.0  ;;  %v377_v34 = vmax.f32 %v345_v24, 0.0  ;;  %v378_v35 = vmax.f32 %v346_v25, 0.0 }
  0x17   : > { %v379_v38 = vmax.f32 %v347_v26, 0.0  ;;  %v380_v39 = vmax.f32 %v348_v27, 0.0  ;;  %v381_v40 = vmax.f32 %v349_v28, 0.0  ;;  %v382_v41 = vmax.f32 %v350_v29, 0.0 }
  0x18   : > { %407 = vst [vmem:[%s759_s28] sm:$0xff] %v375_v32  ;;  %408 = vst [vmem:[%s759_s28 + $0x8] sm:$0xff] %v376_v33  ;;  %v574_v42 = vunpack.c.l.bf16 %v623_v30  ;;  %v575_v43 = vunpack.c.h.bf16 %v623_v30  ;;  %v578_v44 = vunpack.c.l.bf16 %v624_v31  ;;  %v579_v45 = vunpack.c.h.bf16 %v624_v31 }
  0x19   : > { %409 = vst [vmem:[%s759_s28 + $0x10] sm:$0xff] %v377_v34  ;;  %410 = vst [vmem:[%s759_s28 + $0x18] sm:$0xff] %v378_v35  ;;  %v582_v46 = vunpack.c.l.bf16 %v625_v36  ;;  %v583_v47 = vunpack.c.h.bf16 %v625_v36  ;;  %v586_v48 = vunpack.c.l.bf16 %v626_v37  ;;  %v587_v49 = vunpack.c.h.bf16 %v626_v37 }
  0x1a   : > { %411 = vst [vmem:[%s759_s28 + $0x20] sm:$0xff] %v379_v38  ;;  %412 = vst [vmem:[%s759_s28 + $0x28] sm:$0xff] %v380_v39  ;;  %v312_v50 = vmul.f32 %v574_v42, %v732_v0  ;;  %v313_v51 = vmul.f32 %v575_v43, %v732_v0  ;;  %v314_v52 = vmul.f32 %v578_v44, %v732_v0  ;;  %v590_v16 = vunpack.c.l.bf16 %v627_v3 }
  0x1b   : > { %413 = vst [vmem:[%s759_s28 + $0x30] sm:$0xff] %v381_v40  ;;  %414 = vst [vmem:[%s759_s28 + $0x38] sm:$0xff] %v382_v41  ;;  %v315_v53 = vmul.f32 %v579_v45, %v732_v0  ;;  %v316_v54 = vmul.f32 %v582_v46, %v732_v0  ;;  %v317_v55 = vmul.f32 %v583_v47, %v732_v0  ;;  %v591_v17 = vunpack.c.h.bf16 %v627_v3  ;;  %v631_v40 = vld [vmem:[%s727_s20 + $0x60] sm:$0xff]   ;;  %v632_v41 = vld [vmem:[%s727_s20 + $0x68] sm:$0xff]  }
  0x1c   : > { %v318_v56 = vmul.f32 %v586_v48, %v732_v0  ;;  %v319_v57 = vmul.f32 %v587_v49, %v732_v0  ;;  %v351_v58 = vadd.f32 %v741_v9, %v312_v50  ;;  %v352_v59 = vadd.f32 %v741_v9, %v313_v51  ;;  %v633_v46 = vld [vmem:[%s727_s20 + $0x70] sm:$0xff]   ;;  %v634_v47 = vld [vmem:[%s727_s20 + $0x78] sm:$0xff]  }
  0x1d   : > { %v353_v60 = vadd.f32 %v741_v9, %v314_v52  ;;  %v354_v61 = vadd.f32 %v741_v9, %v315_v53  ;;  %v355_v62 = vadd.f32 %v741_v9, %v316_v54  ;;  %v356_v63 = vadd.f32 %v741_v9, %v317_v55 }
  0x1e   : > { %v357_v1 = vadd.f32 %v741_v9, %v318_v56  ;;  %v358_v2 = vadd.f32 %v741_v9, %v319_v57  ;;  %v383_v5 = vmax.f32 %v351_v58, 0.0  ;;  %v384_v6 = vmax.f32 %v352_v59, 0.0 }
  0x1f   : > { %v385_v7 = vmax.f32 %v353_v60, 0.0  ;;  %v386_v8 = vmax.f32 %v354_v61, 0.0  ;;  %v387_v12 = vmax.f32 %v355_v62, 0.0  ;;  %v388_v13 = vmax.f32 %v356_v63, 0.0 }
  0x20   : > { %v389_v14 = vmax.f32 %v357_v1, 0.0  ;;  %v390_v15 = vmax.f32 %v358_v2, 0.0  ;;  %415 = vst [vmem:[%s759_s28 + $0x40] sm:$0xff] %v383_v5  ;;  %416 = vst [vmem:[%s759_s28 + $0x48] sm:$0xff] %v384_v6  ;;  %v594_v18 = vunpack.c.l.bf16 %v628_v4  ;;  %v595_v19 = vunpack.c.h.bf16 %v628_v4 }
  0x21   : > { %417 = vst [vmem:[%s759_s28 + $0x50] sm:$0xff] %v385_v7  ;;  %418 = vst [vmem:[%s759_s28 + $0x58] sm:$0xff] %v386_v8  ;;  %v598_v20 = vunpack.c.l.bf16 %v629_v10  ;;  %v599_v21 = vunpack.c.h.bf16 %v629_v10  ;;  %v602_v22 = vunpack.c.l.bf16 %v630_v11  ;;  %v603_v23 = vunpack.c.h.bf16 %v630_v11 }
  0x22   : > { %419 = vst [vmem:[%s759_s28 + $0x60] sm:$0xff] %v387_v12  ;;  %420 = vst [vmem:[%s759_s28 + $0x68] sm:$0xff] %v388_v13  ;;  %v320_v24 = vmul.f32 %v590_v16, %v732_v0  ;;  %v321_v25 = vmul.f32 %v591_v17, %v732_v0  ;;  %v322_v26 = vmul.f32 %v594_v18, %v732_v0  ;;  %v606_v52 = vunpack.c.l.bf16 %v631_v40 }
  0x23   : > { %421 = vst [vmem:[%s759_s28 + $0x70] sm:$0xff] %v389_v14  ;;  %422 = vst [vmem:[%s759_s28 + $0x78] sm:$0xff] %v390_v15  ;;  %v323_v27 = vmul.f32 %v595_v19, %v732_v0  ;;  %v324_v28 = vmul.f32 %v598_v20, %v732_v0  ;;  %v325_v29 = vmul.f32 %v599_v21, %v732_v0  ;;  %v607_v53 = vunpack.c.h.bf16 %v631_v40 }
  0x24   : > { %v326_v30 = vmul.f32 %v602_v22, %v732_v0  ;;  %v327_v31 = vmul.f32 %v603_v23, %v732_v0  ;;  %v359_v32 = vadd.f32 %v741_v9, %v320_v24  ;;  %v360_v33 = vadd.f32 %v741_v9, %v321_v25 }
  0x25   : > { %v361_v34 = vadd.f32 %v741_v9, %v322_v26  ;;  %v362_v35 = vadd.f32 %v741_v9, %v323_v27  ;;  %v363_v36 = vadd.f32 %v741_v9, %v324_v28  ;;  %v364_v37 = vadd.f32 %v741_v9, %v325_v29 }
  0x26   : > { %v365_v38 = vadd.f32 %v741_v9, %v326_v30  ;;  %v366_v39 = vadd.f32 %v741_v9, %v327_v31  ;;  %v391_v42 = vmax.f32 %v359_v32, 0.0  ;;  %v392_v43 = vmax.f32 %v360_v33, 0.0 }
  0x27   : > { %v393_v44 = vmax.f32 %v361_v34, 0.0  ;;  %v394_v45 = vmax.f32 %v362_v35, 0.0  ;;  %v395_v48 = vmax.f32 %v363_v36, 0.0  ;;  %v396_v49 = vmax.f32 %v364_v37, 0.0 }
  0x28   : > { %v397_v50 = vmax.f32 %v365_v38, 0.0  ;;  %v398_v51 = vmax.f32 %v366_v39, 0.0  ;;  %423 = vst [vmem:[%s759_s28 + $0x80] sm:$0xff] %v391_v42  ;;  %424 = vst [vmem:[%s759_s28 + $0x88] sm:$0xff] %v392_v43  ;;  %v610_v54 = vunpack.c.l.bf16 %v632_v41  ;;  %v611_v55 = vunpack.c.h.bf16 %v632_v41 }
  0x29   : > { %425 = vst [vmem:[%s759_s28 + $0x90] sm:$0xff] %v393_v44  ;;  %426 = vst [vmem:[%s759_s28 + $0x98] sm:$0xff] %v394_v45  ;;  %v614_v56 = vunpack.c.l.bf16 %v633_v46  ;;  %v615_v57 = vunpack.c.h.bf16 %v633_v46  ;;  %v618_v58 = vunpack.c.l.bf16 %v634_v47  ;;  %v619_v59 = vunpack.c.h.bf16 %v634_v47 }
  0x2a   : > { %427 = vst [vmem:[%s759_s28 + $0xa0] sm:$0xff] %v395_v48  ;;  %428 = vst [vmem:[%s759_s28 + $0xa8] sm:$0xff] %v396_v49  ;;  %v328_v60 = vmul.f32 %v606_v52, %v732_v0  ;;  %v329_v61 = vmul.f32 %v607_v53, %v732_v0  ;;  %v330_v62 = vmul.f32 %v610_v54, %v732_v0 }
  0x2b   : > { %429 = vst [vmem:[%s759_s28 + $0xb0] sm:$0xff] %v397_v50  ;;  %430 = vst [vmem:[%s759_s28 + $0xb8] sm:$0xff] %v398_v51  ;;  %v331_v63 = vmul.f32 %v611_v55, %v732_v0  ;;  %v332_v1 = vmul.f32 %v614_v56, %v732_v0  ;;  %v333_v2 = vmul.f32 %v615_v57, %v732_v0 }
  0x2c   : > { %v334_v3 = vmul.f32 %v618_v58, %v732_v0  ;;  %v335_v4 = vmul.f32 %v619_v59, %v732_v0  ;;  %v367_v5 = vadd.f32 %v741_v9, %v328_v60  ;;  %v368_v6 = vadd.f32 %v741_v9, %v329_v61 }
  0x2d   : > { %v369_v7 = vadd.f32 %v741_v9, %v330_v62  ;;  %v370_v8 = vadd.f32 %v741_v9, %v331_v63  ;;  %v371_v10 = vadd.f32 %v741_v9, %v332_v1  ;;  %v372_v11 = vadd.f32 %v741_v9, %v333_v2 }
  0x2e   : > { %v373_v0 = vadd.f32 %v741_v9, %v334_v3  ;;  %v374_v12 = vadd.f32 %v741_v9, %v335_v4  ;;  %v399_v13 = vmax.f32 %v367_v5, 0.0  ;;  %v400_v14 = vmax.f32 %v368_v6, 0.0 }
  0x2f   : > { %v401_v15 = vmax.f32 %v369_v7, 0.0  ;;  %v402_v16 = vmax.f32 %v370_v8, 0.0  ;;  %v403_v17 = vmax.f32 %v371_v10, 0.0  ;;  %v404_v18 = vmax.f32 %v372_v11, 0.0 }
  0x30   : > { %v405_v19 = vmax.f32 %v373_v0, 0.0  ;;  %v406_v20 = vmax.f32 %v374_v12, 0.0  ;;  %431 = vst [vmem:[%s759_s28 + $0xc0] sm:$0xff] %v399_v13  ;;  %432 = vst [vmem:[%s759_s28 + $0xc8] sm:$0xff] %v400_v14 }
  0x31   : > { %433 = vst [vmem:[%s759_s28 + $0xd0] sm:$0xff] %v401_v15  ;;  %434 = vst [vmem:[%s759_s28 + $0xd8] sm:$0xff] %v402_v16 }
  0x32   : > { %435 = vst [vmem:[%s759_s28 + $0xe0] sm:$0xff] %v403_v17  ;;  %436 = vst [vmem:[%s759_s28 + $0xe8] sm:$0xff] %v404_v18 }
  0x33   : > { %437 = vst [vmem:[%s759_s28 + $0xf0] sm:$0xff] %v405_v19  ;;  %438 = vst [vmem:[%s759_s28 + $0xf8] sm:$0xff] %v406_v20 }
  0x34 PF: > { %s13_s14 = sadd.s32 1, %s681_s14   ;;  %s870_s12 = smov %s677_s13 }
  0x35   : > { %p10_p5 = scmp.ge.s32.totalorder %s13_s14, 4   ;;  %s871_s13 = smov %s873_s15 }
  0x37   :  { %12 = sbr.rel (!%p10_p5) target bundleno = 2 (0x2), region = 68 }

// kernel: basic_conv2d.2
= control target key start
LH: loop header
LB: loop body
LE: loop exit
PB: predicated region body
PF: predicated region fallthrough
CT: control target
= control target key end

     0   :  { %s1529_s12 = smov 0   ;;  %s1531_s13 = smov 0   ;;  %s1727_s0 = inlined_call_operand.vmem [shape: bf16[512,128], index: 0, kind: input, shape index: {}]   ;;  %s1728_s1 = inlined_call_operand.vmem [shape: bf16[128,128], index: 1, kind: input, shape index: {}]   ;;  %s1729_s2 = inlined_call_operand.vmem [shape: bf16[512,128], index: 2, kind: output, shape index: {0}]   ;;  %s1730_s3 = inlined_call_operand.vmem [shape: f32[2,2,128], index: 3, kind: output, shape index: {1}]  }
   0x1   :  { %s1533_s14 = smov 0  }
   0x2 LB: > { %s33_s15 = sadd.s32 1, %s1503_s13  ;;  %p1158_p0 = scmp.ge.s32.totalorder %s1507_s14, 1  ;;  %s1507_s14 = sphi %s1533_s14, %s14_s14   ;;  %s1503_s13 = sphi %s1531_s13, %s1732_s13   ;;  %s1499_s12 = sphi %s1529_s12, %s1731_s12  }
   0x3   : > { %p35_p1 = scmp.ge.s32.totalorder %s33_s15, 2  ;;  %p169_p2 = scmp.lt.s32.totalorder %s1507_s14, 3 }
   0x5   : > { %s1734_s15 = smov (%p35_p1, %s33_s15), 0  ;;  %p170_p3 = pnand %p1158_p0, %p169_p2 }
   0x6   : > { %s1159_s18 = sshll.u32 (!%p170_p3), %s1499_s12, 5  ;;  %p224_p5 = scmp.lt.s32.totalorder (!%p170_p3), %s1499_s12, 1 }
   0x7   : > { %173 = sbr.rel (%p170_p3) target bundleno = 321 (0x141), region = 28  ;;  %p207_p4 = scmp.lt.s32.totalorder (!%p170_p3), %s1159_s18, 63 }
   0xc   : > { %v1461_v0 = vld [vmem:[%s1728_s1 + $0x38] sm:$0xff]   ;;  %v1462_v1 = vld [vmem:[%s1728_s1 + $0x30] sm:$0xff]   ;;  %s1736_s18 = smov (!%p207_p4, %s1159_s18), 63  ;;  %v1463_v2 = vld [vmem:[%s1728_s1 + $0x28] sm:$0xff]   ;;  %s1738_s12 = smov (!%p224_p5, %s1499_s12), 1 }
   0xd   : > { %1373 = vmatprep.subr.bf16.mxu0 %v1461_v0  ;;  %1421 = vmatprep.subr.bf16.mxu1 %v1461_v0  ;;  %s1160_s23 = sshll.u32 %s1736_s18, 2  ;;  %v1464_v3 = vld [vmem:[%s1728_s1 + $0x20] sm:$0xff]   ;;  %v1465_v5 = vld [vmem:[%s1728_s1 + $0x18] sm:$0xff]   ;;  %v1466_v6 = vld [vmem:[%s1728_s1 + $0x10] sm:$0xff]   ;;  %s1163_s17 = sshll.u32 %s1738_s12, 1 }
   0xe   : > { %1374 = vmatpush3.bf16.msra.mxu0 %v1461_v0  ;;  %1429 = vmatpush3.bf16.msra.mxu1 %v1461_v0  ;;  %s1567_s26 = scalar_lea.vmem %s1727_s0, %s1160_s23  ;;  %v1467_v8 = vld [vmem:[%s1728_s1 + $0x8] sm:$0xff]   ;;  %v1468_v9 = vld [vmem:[%s1728_s1] sm:$0xff]   ;;  %s1609_s16 = scalar_lea.vmem %s1729_s2, %s1160_s23 }
   0xf   : > { %1375 = vmatprep.subr.bf16.mxu0 %v1462_v1  ;;  %1422 = vmatprep.subr.bf16.mxu1 %v1462_v1  ;;  %v1469_v4 = vld [vmem:[%s1567_s26] sm:$0xff]   ;;  %v1470_v10 = vld [vmem:[%s1567_s26 + $0x8] sm:$0xff]   ;;  %v1471_v12 = vld [vmem:[%s1567_s26 + $0x10] sm:$0xff]   ;;  %s230_s20 = scalar_lea.vmem %s1730_s3, %s1163_s17 }
  0x10   : > { %1389 = vmatprep.mubr.bf16.mxu0 %v1469_v4  ;;  %v1477_v7 = vld [vmem:[%s1567_s26 + $0x40] sm:$0xff]   ;;  %v1478_v11 = vld [vmem:[%s1567_s26 + $0x48] sm:$0xff]   ;;  %v1479_v13 = vld [vmem:[%s1567_s26 + $0x50] sm:$0xff]  }
  0x11   : > { %1405 = vmatprep.mubr.bf16.mxu1 %v1477_v7  ;;  %v1472_v14 = vld [vmem:[%s1567_s26 + $0x18] sm:$0xff]   ;;  %v1473_v16 = vld [vmem:[%s1567_s26 + $0x20] sm:$0xff]   ;;  %v1474_v18 = vld [vmem:[%s1567_s26 + $0x28] sm:$0xff]  }
  0x12   : > { %1376 = vmatpush3.bf16.msra.mxu0 %v1462_v1  ;;  %1430 = vmatpush3.bf16.msra.mxu1 %v1462_v1  ;;  %v1480_v15 = vld [vmem:[%s1567_s26 + $0x58] sm:$0xff]   ;;  %v1481_v17 = vld [vmem:[%s1567_s26 + $0x60] sm:$0xff]   ;;  %v1482_v19 = vld [vmem:[%s1567_s26 + $0x68] sm:$0xff]  }
  0x13   : > { %1377 = vmatprep.subr.bf16.mxu0 %v1463_v2  ;;  %1423 = vmatprep.subr.bf16.mxu1 %v1463_v2  ;;  %v1475_v20 = vld [vmem:[%s1567_s26 + $0x30] sm:$0xff]   ;;  %v1476_v22 = vld [vmem:[%s1567_s26 + $0x38] sm:$0xff]  }
  0x14   : > { %v1483_v21 = vld [vmem:[%s1567_s26 + $0x70] sm:$0xff]   ;;  %v1484_v23 = vld [vmem:[%s1567_s26 + $0x78] sm:$0xff]  }
  0x16   : > { %1378 = vmatpush3.bf16.msra.mxu0 %v1463_v2  ;;  %1431 = vmatpush3.bf16.msra.mxu1 %v1463_v2 }
  0x17   : > { %1379 = vmatprep.subr.bf16.mxu0 %v1464_v3  ;;  %1424 = vmatprep.subr.bf16.mxu1 %v1464_v3 }
  0x1a   : > { %1380 = vmatpush3.bf16.msra.mxu0 %v1464_v3  ;;  %1432 = vmatpush3.bf16.msra.mxu1 %v1464_v3 }
  0x1b   : > { %1381 = vmatprep.subr.bf16.mxu0 %v1465_v5  ;;  %1425 = vmatprep.subr.bf16.mxu1 %v1465_v5 }
  0x1e   : > { %1382 = vmatpush3.bf16.msra.mxu0 %v1465_v5  ;;  %1433 = vmatpush3.bf16.msra.mxu1 %v1465_v5 }
  0x1f   : > { %1383 = vmatprep.subr.bf16.mxu0 %v1466_v6  ;;  %1426 = vmatprep.subr.bf16.mxu1 %v1466_v6 }
  0x22   : > { %1384 = vmatpush3.bf16.msra.mxu0 %v1466_v6  ;;  %1434 = vmatpush3.bf16.msra.mxu1 %v1466_v6 }
  0x23   : > { %1385 = vmatprep.subr.bf16.mxu0 %v1467_v8  ;;  %1427 = vmatprep.subr.bf16.mxu1 %v1467_v8 }
  0x26   : > { %1386 = vmatpush3.bf16.msra.mxu0 %v1467_v8  ;;  %1435 = vmatpush3.bf16.msra.mxu1 %v1467_v8 }
  0x27   : > { %1387 = vmatprep.subr.bf16.mxu0 %v1468_v9  ;;  %1428 = vmatprep.subr.bf16.mxu1 %v1468_v9 }
  0x2a   : > { %1388 = vmatpush3.bf16.msra.mxu0 %v1468_v9  ;;  %1436 = vmatpush3.bf16.msra.mxu1 %v1468_v9 }
  0x2d   : > { %1390 = vmatmul.mubr.bf16.vlgmr.msra.gmra.mxu0 %v1470_v10  ;;  %1406 = vmatmul.mubr.bf16.vlgmr.msra.gmra.mxu1 %v1478_v11 }
  0x2e   : > { %1393 = vmatprep.mubr.bf16.mxu0 %v1471_v12  ;;  %1409 = vmatprep.mubr.bf16.mxu1 %v1479_v13 }
  0x35   : > { %1394 = vmatmul.mubr.bf16.gmra.mxu0 %v1472_v14  ;;  %1410 = vmatmul.mubr.bf16.gmra.mxu1 %v1480_v15 }
  0x36   : > { %1397 = vmatprep.mubr.bf16.mxu0 %v1473_v16  ;;  %1413 = vmatprep.mubr.bf16.mxu1 %v1481_v17 }
  0x3d   : > { %1398 = vmatmul.mubr.bf16.gmra.mxu0 %v1474_v18  ;;  %1414 = vmatmul.mubr.bf16.gmra.mxu1 %v1482_v19 }
  0x3e   : > { %1401 = vmatprep.mubr.bf16.mxu0 %v1475_v20  ;;  %1417 = vmatprep.mubr.bf16.mxu1 %v1483_v21 }
  0x45   : > { %1402 = vmatmul.mubr.bf16.gmra.mxu0 %v1476_v22  ;;  %1418 = vmatmul.mubr.bf16.gmra.mxu1 %v1484_v23 }
  0xed   : > { %v1391_v24 = vpop.f32.mrf.mxu0  ;;  %v1600_v25 = vpop.f32.mrf.mxu1 }
  0xee   : > { %v961_v41 = vmul.f32 %v1391_v24, %v1391_v24 }
  0xef   : > { %v535_v26 = vpop.f32.mrf.mxu0  ;;  %v1602_v27 = vpop.f32.mrf.mxu1 }
  0xf0   : > { %v959_v32 = vmul.f32 %v535_v26, %v535_v26 }
  0xf1   : > { %v1392_v28 = vpop.f32.mrf.mxu0  ;;  %v1611_v29 = vpop.f32.mrf.mxu1 }
  0xf2   : > { %v1262_v30 = vpack.c.bf16 %v1392_v28, %v1391_v24  ;;  %v1302_v31 = vpack.c.bf16 %v1611_v29, %v1600_v25  ;;  %v962_v46 = vmul.f32 %v1392_v28, %v1392_v28 }
  0xf3   : > { %v538_v33 = vpop.f32.mrf.mxu0  ;;  %v1615_v34 = vpop.f32.mrf.mxu1 }
  0xf4   : > { %1334 = vst [vmem:[%s1609_s16 + $0x8] sm:$0xff] %v1262_v30   ;;  %v1257_v35 = vpack.c.bf16 %v538_v33, %v535_v26  ;;  %v921_v36 = vadd.f32 %v538_v33, %v535_v26  ;;  %v960_v37 = vmul.f32 %v538_v33, %v538_v33  ;;  %1342 = vst [vmem:[%s1609_s16 + $0x48] sm:$0xff] %v1302_v31  }
  0xf5   : > { %v1297_v38 = vpack.c.bf16 %v1615_v34, %v1602_v27  ;;  %v1395_v39 = vpop.f32.mrf.mxu0  ;;  %v1621_v40 = vpop.f32.mrf.mxu1 }
  0xf6   : > { %1258 = vst [vmem:[%s1609_s16] sm:$0xff] %v1257_v35   ;;  %v922_v42 = vadd.f32 %v1391_v24, %v921_v36  ;;  %v991_v43 = vadd.f32 %v960_v37, %v959_v32  ;;  %v965_v1 = vmul.f32 %v1395_v39, %v1395_v39 }
  0xf7   : > { %1341 = vst [vmem:[%s1609_s16 + $0x40] sm:$0xff] %v1297_v38   ;;  %v551_v44 = vpop.f32.mrf.mxu0  ;;  %v1625_v45 = vpop.f32.mrf.mxu1 }
  0xf8   : > { %v992_v47 = vadd.f32 %v991_v43, %v961_v41  ;;  %v923_v48 = vadd.f32 %v1392_v28, %v922_v42  ;;  %v963_v52 = vmul.f32 %v551_v44, %v551_v44 }
  0xf9   : > { %v1396_v49 = vpop.f32.mrf.mxu0  ;;  %v1627_v50 = vpop.f32.mrf.mxu1 }
  0xfa   : > { %v924_v51 = vadd.f32 %v923_v48, %v551_v44  ;;  %v993_v53 = vadd.f32 %v992_v47, %v962_v46  ;;  %v1272_v54 = vpack.c.bf16 %v1396_v49, %v1395_v39  ;;  %v1312_v56 = vpack.c.bf16 %v1627_v50, %v1621_v40 }
  0xfb   : > { %v554_v55 = vpop.f32.mrf.mxu0  ;;  %v1631_v57 = vpop.f32.mrf.mxu1  ;;  %v966_v6 = vmul.f32 %v1396_v49, %v1396_v49 }
  0xfc   : > { %v994_v58 = vadd.f32 %v993_v53, %v963_v52  ;;  %1336 = vst [vmem:[%s1609_s16 + $0x18] sm:$0xff] %v1272_v54   ;;  %v1267_v59 = vpack.c.bf16 %v554_v55, %v551_v44  ;;  %v925_v60 = vadd.f32 %v924_v51, %v554_v55  ;;  %v964_v61 = vmul.f32 %v554_v55, %v554_v55 }
  0xfd   : > { %v1399_v62 = vpop.f32.mrf.mxu0  ;;  %1344 = vst [vmem:[%s1609_s16 + $0x58] sm:$0xff] %v1312_v56   ;;  %v1307_v63 = vpack.c.bf16 %v1631_v57, %v1625_v45  ;;  %v1637_v0 = vpop.f32.mrf.mxu1 }
  0xfe   : > { %1335 = vst [vmem:[%s1609_s16 + $0x10] sm:$0xff] %v1267_v59   ;;  %v926_v2 = vadd.f32 %v1395_v39, %v925_v60  ;;  %v995_v3 = vadd.f32 %v994_v58, %v964_v61  ;;  %v969_v26 = vmul.f32 %v1399_v62, %v1399_v62  ;;  %v975_v61 = vmul.f32 %v1602_v27, %v1602_v27 }
  0xff   : > { %v567_v4 = vpop.f32.mrf.mxu0  ;;  %1343 = vst [vmem:[%s1609_s16 + $0x50] sm:$0xff] %v1307_v63   ;;  %v1641_v5 = vpop.f32.mrf.mxu1 }
 0x100   : > { %v996_v7 = vadd.f32 %v995_v3, %v965_v1  ;;  %v927_v8 = vadd.f32 %v1396_v49, %v926_v2  ;;  %v967_v12 = vmul.f32 %v567_v4, %v567_v4  ;;  %v976_v2 = vmul.f32 %v1615_v34, %v1615_v34 }
 0x101   : > { %v1400_v9 = vpop.f32.mrf.mxu0  ;;  %v1643_v10 = vpop.f32.mrf.mxu1 }
 0x102   : > { %v928_v11 = vadd.f32 %v927_v8, %v567_v4  ;;  %v997_v13 = vadd.f32 %v996_v7, %v966_v6  ;;  %v1282_v14 = vpack.c.bf16 %v1400_v9, %v1399_v62  ;;  %v1322_v16 = vpack.c.bf16 %v1643_v10, %v1637_v0 }
 0x103   : > { %v570_v15 = vpop.f32.mrf.mxu0  ;;  %v1647_v17 = vpop.f32.mrf.mxu1  ;;  %v970_v33 = vmul.f32 %v1400_v9, %v1400_v9  ;;  %v978_v8 = vmul.f32 %v1611_v29, %v1611_v29 }
 0x104   : > { %v998_v18 = vadd.f32 %v997_v13, %v967_v12  ;;  %1338 = vst [vmem:[%s1609_s16 + $0x28] sm:$0xff] %v1282_v14   ;;  %v1277_v19 = vpack.c.bf16 %v570_v15, %v567_v4  ;;  %v929_v20 = vadd.f32 %v928_v11, %v570_v15  ;;  %v968_v21 = vmul.f32 %v570_v15, %v570_v15 }
 0x105   : > { %v1403_v22 = vpop.f32.mrf.mxu0  ;;  %1346 = vst [vmem:[%s1609_s16 + $0x68] sm:$0xff] %v1322_v16   ;;  %v1317_v23 = vpack.c.bf16 %v1647_v17, %v1641_v5  ;;  %v1653_v24 = vpop.f32.mrf.mxu1  ;;  %v977_v4 = vmul.f32 %v1600_v25, %v1600_v25  ;;  %v979_v12 = vmul.f32 %v1625_v45, %v1625_v45  ;;  %v980_v15 = vmul.f32 %v1631_v57, %v1631_v57 }
 0x106   : > { %1337 = vst [vmem:[%s1609_s16 + $0x20] sm:$0xff] %v1277_v19   ;;  %v930_v28 = vadd.f32 %v1399_v62, %v929_v20  ;;  %v999_v30 = vadd.f32 %v998_v18, %v968_v21  ;;  %v973_v54 = vmul.f32 %v1403_v22, %v1403_v22  ;;  %v983_v21 = vmul.f32 %v1641_v5, %v1641_v5 }
 0x107   : > { %v583_v31 = vpop.f32.mrf.mxu0  ;;  %1345 = vst [vmem:[%s1609_s16 + $0x60] sm:$0xff] %v1317_v23   ;;  %v1657_v32 = vpop.f32.mrf.mxu1 }
 0x108   : > { %v1000_v35 = vadd.f32 %v999_v30, %v969_v26  ;;  %v931_v36 = vadd.f32 %v1400_v9, %v930_v28  ;;  %v971_v41 = vmul.f32 %v583_v31, %v583_v31  ;;  %v984_v26 = vmul.f32 %v1647_v17, %v1647_v17 }
 0x109   : > { %v1404_v37 = vpop.f32.mrf.mxu0  ;;  %v1659_v38 = vpop.f32.mrf.mxu1 }
 0x10a   : > { %v932_v39 = vadd.f32 %v931_v36, %v583_v31  ;;  %v1001_v42 = vadd.f32 %v1000_v35, %v970_v33  ;;  %v1292_v43 = vpack.c.bf16 %v1404_v37, %v1403_v22  ;;  %v1332_v46 = vpack.c.bf16 %v1659_v38, %v1653_v24 }
 0x10b   : > { %v586_v44 = vpop.f32.mrf.mxu0  ;;  %v650_v47 = vpop.f32.mrf.mxu1  ;;  %v974_v58 = vmul.f32 %v1404_v37, %v1404_v37  ;;  %v987_v35 = vmul.f32 %v1657_v32, %v1657_v32 }
 0x10c   : > { %v1002_v48 = vadd.f32 %v1001_v42, %v971_v41  ;;  %1340 = vst [vmem:[%s1609_s16 + $0x38] sm:$0xff] %v1292_v43   ;;  %v1287_v49 = vpack.c.bf16 %v586_v44, %v583_v31  ;;  %v933_v51 = vadd.f32 %v932_v39, %v586_v44  ;;  %v972_v52 = vmul.f32 %v586_v44, %v586_v44 }
 0x10d   : > { %1348 = vst [vmem:[%s1609_s16 + $0x78] sm:$0xff] %v1332_v46   ;;  %v1327_v53 = vpack.c.bf16 %v650_v47, %v1657_v32  ;;  %v988_v39 = vmul.f32 %v650_v47, %v650_v47  ;;  %v990_v43 = vmul.f32 %v1659_v38, %v1659_v38 }
 0x10e   : > { %1339 = vst [vmem:[%s1609_s16 + $0x30] sm:$0xff] %v1287_v49   ;;  %v934_v55 = vadd.f32 %v1403_v22, %v933_v51  ;;  %v1003_v56 = vadd.f32 %v1002_v48, %v972_v52 }
 0x10f   : > { %1347 = vst [vmem:[%s1609_s16 + $0x70] sm:$0xff] %v1327_v53  }
 0x110   : > { %v935_v59 = vadd.f32 %v1404_v37, %v934_v55  ;;  %v1004_v60 = vadd.f32 %v1003_v56, %v973_v54 }
 0x112   : > { %v1005_v62 = vadd.f32 %v1004_v60, %v974_v58  ;;  %v936_v63 = vadd.f32 %v935_v59, %v1602_v27 }
 0x114   : > { %v937_v1 = vadd.f32 %v936_v63, %v1615_v34  ;;  %v1006_v3 = vadd.f32 %v1005_v62, %v975_v61 }
 0x116   : > { %v938_v6 = vadd.f32 %v1600_v25, %v937_v1  ;;  %v1007_v7 = vadd.f32 %v1006_v3, %v976_v2  ;;  %v981_v25 = vmul.f32 %v1621_v40, %v1621_v40 }
 0x118   : > { %v1008_v9 = vadd.f32 %v1007_v7, %v977_v4  ;;  %v939_v11 = vadd.f32 %v1611_v29, %v938_v6  ;;  %v982_v29 = vmul.f32 %v1627_v50, %v1627_v50 }
 0x11a   : > { %v940_v27 = vadd.f32 %v939_v11, %v1625_v45  ;;  %v1009_v13 = vadd.f32 %v1008_v9, %v978_v8 }
 0x11c   : > { %v1010_v34 = vadd.f32 %v1009_v13, %v979_v12  ;;  %v941_v14 = vadd.f32 %v940_v27, %v1631_v57 }
 0x11e   : > { %v942_v16 = vadd.f32 %v1621_v40, %v941_v14  ;;  %v1011_v18 = vadd.f32 %v1010_v34, %v980_v15  ;;  %v985_v40 = vmul.f32 %v1637_v0, %v1637_v0 }
 0x120   : > { %v1012_v19 = vadd.f32 %v1011_v18, %v981_v25  ;;  %v943_v20 = vadd.f32 %v1627_v50, %v942_v16  ;;  %v986_v50 = vmul.f32 %v1643_v10, %v1643_v10 }
 0x122   : > { %v944_v45 = vadd.f32 %v943_v20, %v1641_v5  ;;  %v1013_v22 = vadd.f32 %v1012_v19, %v982_v29 }
 0x124   : > { %v1014_v23 = vadd.f32 %v1013_v22, %v983_v21  ;;  %v945_v57 = vadd.f32 %v944_v45, %v1647_v17 }
 0x126   : > { %v946_v28 = vadd.f32 %v1637_v0, %v945_v57  ;;  %v1015_v30 = vadd.f32 %v1014_v23, %v984_v26  ;;  %v989_v0 = vmul.f32 %v1653_v24, %v1653_v24 }
 0x128   : > { %v1016_v31 = vadd.f32 %v1015_v30, %v985_v40  ;;  %v947_v5 = vadd.f32 %v1643_v10, %v946_v28 }
 0x12a   : > { %v948_v33 = vadd.f32 %v947_v5, %v1657_v32  ;;  %v1017_v17 = vadd.f32 %v1016_v31, %v986_v50 }
 0x12c   : > { %v1018_v36 = vadd.f32 %v1017_v17, %v987_v35  ;;  %v949_v37 = vadd.f32 %v948_v33, %v650_v47 }
 0x12e   : > { %v950_v41 = vadd.f32 %v1653_v24, %v949_v37  ;;  %v1019_v42 = vadd.f32 %v1018_v36, %v988_v39 }
 0x130   : > { %v951_v10 = vadd.f32 %v1659_v38, %v950_v41  ;;  %v1020_v44 = vadd.f32 %v1019_v42, %v989_v0 }
 0x132   : > { %v952_v46 = vrot.slane %v951_v10, 4  ;;  %v1021_v48 = vadd.f32 %v1020_v44, %v990_v43 }
 0x134   : > { %v953_v32 = vadd.f32 %v952_v46, %v951_v10  ;;  %v1022_v49 = vrot.slane %v1021_v48, 4 }
 0x136   : > { %v954_v51 = vrot.slane %v953_v32, 2  ;;  %v1023_v47 = vadd.f32 %v1022_v49, %v1021_v48 }
 0x138   : > { %v955_v52 = vadd.f32 %v954_v51, %v953_v32  ;;  %v1024_v53 = vrot.slane %v1023_v47, 2 }
 0x13a   : > { %v956_v54 = vrot.slane %v955_v52, 1  ;;  %v1025_v24 = vadd.f32 %v1024_v53, %v1023_v47 }
 0x13c   : > { %v957_v55 = vadd.f32 %v956_v54, %v955_v52  ;;  %v1026_v56 = vrot.slane %v1025_v24, 1 }
 0x13e   : > { %958 = vst [vmem:[%s230_s20] sm:$0x1] %v957_v55  ;;  %v1027_v38 = vadd.f32 %v1026_v56, %v1025_v24 }
 0x140   : > { %1028 = vst [vmem:[%s230_s20 + $0x1] sm:$0x1] %v1027_v38 }
 0x141 PF: > { %s14_s14 = sadd.s32 1, %s1507_s14   ;;  %s1731_s12 = smov %s1503_s13 }
 0x142   : > { %p11_p6 = scmp.ge.s32.totalorder %s14_s14, 4   ;;  %s1732_s13 = smov %s1734_s15 }
 0x144   :  { %13 = sbr.rel (!%p11_p6) target bundleno = 2 (0x2), region = 79 }

</bundles_post_ra>
